<compile_context>
chip_gen: v7x
topology: tpu7x:2x2x1
jax: 0.10.0
libtpu: 0.0.40
codegen_flags: <defaults>
</compile_context>

<pallas_src>
import math

import jax
import jax.numpy as jnp
from jax import lax
from jax.experimental import pallas as pl
from jax.experimental.pallas import tpu as pltpu


_SQRT2 = math.sqrt(2.0)
_MU = 0.2
_INV_POS_SCALE = float(1.0 / (0.5 * _SQRT2))   # erf argument scale, positive pairs
_INV_NEG_SCALE = float(1.0 / (0.2 * _SQRT2))   # erf argument scale, negative pairs
_ERF_ARG_CLAMP = 3.9                           # erf(3.9) == 1 to ~2.5e-8

_RESIDENT_X_BYTES = 6 * 1024 * 1024   # keep normalized X resident in VMEM up to this
_STRIP_BYTES = 2 * 1024 * 1024        # cap on one (tm, n_pad) f32 plane (resident path)


def _erf_f32(x):
    """float32 erf via the Eigen/XLA rational approximation (VPU/EUP only).

    Callers clamp the argument to <= 3.9 before calling, so no internal clamp is
    needed.  The final divide is an approximate EUP reciprocal (free slot).
    """
    x2 = x * x
    alpha = jnp.float32(-2.72614225801306e-10)
    alpha = alpha * x2 + jnp.float32(2.77068142495902e-08)
    alpha = alpha * x2 + jnp.float32(-2.10102402082508e-06)
    alpha = alpha * x2 + jnp.float32(-5.69250639462346e-05)
    alpha = alpha * x2 + jnp.float32(-7.34990630326855e-04)
    alpha = alpha * x2 + jnp.float32(-2.95459980854025e-03)
    alpha = alpha * x2 + jnp.float32(-1.60960333262415e-02)
    beta = jnp.float32(-1.45660718464996e-05)
    beta = beta * x2 + jnp.float32(-2.13374055278905e-04)
    beta = beta * x2 + jnp.float32(-1.68282697438203e-03)
    beta = beta * x2 + jnp.float32(-7.37332916720468e-03)
    beta = beta * x2 + jnp.float32(-1.42647390514189e-02)
    return x * alpha * pl.reciprocal(beta, approx=True)


def _pair_loss(pangle, pos_mask, m):
    """w(pair) * pair for one tile; the branch-constant terms are added in the wrapper."""
    pair = jnp.where(pos_mask, 1.0 - pangle, jnp.maximum(pangle - m, 0.0))
    inv_scale = jnp.where(pos_mask, _INV_POS_SCALE, _INV_NEG_SCALE)
    arg = jnp.minimum((pair - _MU) * inv_scale, _ERF_ARG_CLAMP)
    w = 0.5 * (1.0 + _erf_f32(arg))
    return w * pair


# ----------------------------------------------------------------------------
# Kernels
# ----------------------------------------------------------------------------
def _make_resident_kernel(tm, n_pad, n_actual):
    """Grid over row strips; normalized X and labels are VMEM-resident."""
    masked = n_pad != n_actual

    def kernel(scal_ref, xn_ref, pc_ref, pr_ref, out_ref):
        m = scal_ref[0]
        r0 = pl.multiple_of(pl.program_id(0) * tm, tm)
        xr = xn_ref[pl.ds(r0, tm), :]                         # (tm, D) row strip
        # pairwise cosine straight off the MXU (X is pre-normalized, f32 accumulate)
        pangle = lax.dot_general(
            xr, xn_ref[...],
            dimension_numbers=(((1,), (1,)), ((), ())),
            preferred_element_type=jnp.float32)               # (tm, n_pad)
        pos_mask = pc_ref[pl.ds(r0, tm), :] == pr_ref[...]    # (tm,1)==(1,n_pad)
        loss = _pair_loss(pangle, pos_mask, m)
        if masked:
            # padded columns: one iota-compare per strip, one multiply per element
            ci = lax.broadcasted_iota(jnp.int32, (1, n_pad), 1)
            loss = loss * (ci < n_actual).astype(jnp.float32)
        out_ref[...] = jnp.sum(loss, axis=1, keepdims=True)   # (tm, 1)

    return kernel


def _make_streaming_kernel(tm, tn, n_actual, n_pad):
    """Fallback for very large N*D: 2-D tiled grid, column tiles streamed."""
    masked = n_pad != n_actual

    def kernel(scal_ref, xr_ref, xc_ref, pc_ref, pr_ref, out_ref, acc_ref):
        j = pl.program_id(1)
        m = scal_ref[0]
        pangle = lax.dot_general(
            xr_ref[...], xc_ref[...],
            dimension_numbers=(((1,), (1,)), ((), ())),
            preferred_element_type=jnp.float32)               # (tm, tn)
        pos_mask = pc_ref[...] == pr_ref[...]
        loss = _pair_loss(pangle, pos_mask, m)
        if masked:
            ci = lax.broadcasted_iota(jnp.int32, (1, tn), 1) + j * tn
            loss = loss * (ci < n_actual).astype(jnp.float32)
        rowsum = jnp.sum(loss, axis=1, keepdims=True)

        @pl.when(j == 0)
        def _():
            acc_ref[...] = jnp.zeros_like(acc_ref)
        acc_ref[...] += rowsum

        # write the output block only once per row tile (v5e has a single store slot)
        @pl.when(j == pl.num_programs(1) - 1)
        def _():
            out_ref[...] = acc_ref[...]

    return kernel


# ----------------------------------------------------------------------------
# Wrapper
# ----------------------------------------------------------------------------
def _round_up(x, mult):
    return ((x + mult - 1) // mult) * mult


def _resident_tiles(n):
    """(n_pad, tm): n_pad a small padding of n, tm dividing n_pad, multiple of 8,
    (tm, n_pad) f32 strip <= _STRIP_BYTES, and >= 2 row strips when it matters."""
    if n <= 64:
        n_pad = _round_up(n, 8)
        return n_pad, n_pad
    if n <= 256:
        n_pad = _round_up(n, 16)
        return n_pad, n_pad // 2          # two strips -> both TCs on v7x
    n_pad = _round_up(n, 128)
    tm = 128
    for cand in (512, 256):
        if n_pad % cand == 0 and cand * n_pad * 4 <= _STRIP_BYTES and n_pad // cand >= 2:
            tm = cand
            break
    while tm > 8 and tm * n_pad * 4 > _STRIP_BYTES:
        tm //= 2
    return n_pad, tm


def _streaming_tiles(n, d_feat, itemsize):
    n_pad = _round_up(n, 256)
    tile = 256
    if n_pad % 512 == 0 and 4 * 512 * d_feat * itemsize <= (28 << 20):
        tile = 512
    elif 4 * 256 * d_feat * itemsize > (28 << 20):
        tile = 128   # TODO(synk): block over the feature dim for extremely large D
    return n_pad, tile, tile


def _num_pos_pairs(p_flat):
    """sum_{i,j} [p_i == p_j] (including the diagonal), O(n log n), as float32."""
    n = p_flat.shape[0]
    s = jnp.sort(p_flat)
    grp = jnp.cumsum(
        jnp.concatenate([jnp.zeros((1,), jnp.int32),
                         (s[1:] != s[:-1]).astype(jnp.int32)]))
    counts = jax.ops.segment_sum(jnp.ones((n,), jnp.float32), grp,
                                 num_segments=n, indices_are_sorted=True)
    return jnp.sum(counts * counts)


def _domain_loss(represent, p, m, *, resident_x_bytes=_RESIDENT_X_BYTES):
    n, d_feat = represent.shape
    if n == 1:
        # PyTorch returns torch.zeros(1) in this degenerate case.
        return jnp.zeros((), jnp.float32)

    in_dtype = represent.dtype
    itemsize = jnp.dtype(in_dtype).itemsize

    # ---- normalize rows ONCE (hoisted out of the kernel's inner loop) -------
    x32 = represent.astype(jnp.float32)
    xn = (x32 * lax.rsqrt(jnp.sum(x32 * x32, axis=-1, keepdims=True))).astype(in_dtype)

    p_flat = jnp.reshape(p, (n,)).astype(jnp.int32)

    # ---- branch-constant additive term (no per-element work in the kernel) --
    # positive pairs: neg_pair_loss == max(0, -m)  -> weighted term k_m
    # negative pairs: pos_pair_loss == 1           -> weighted term c_neg
    m_f = jnp.asarray(m, jnp.float32)
    npp = jnp.maximum(jnp.float32(0.0), -m_f)
    k_m = (0.5 * (1.0 + jax.scipy.special.erf((npp - _MU) / (0.2 * _SQRT2)))) * npp
    c_neg = jnp.float32(0.5 * (1.0 + math.erf((1.0 - _MU) / (0.5 * _SQRT2))))
    num_pos = _num_pos_pairs(p_flat)                 # includes the diagonal
    num_neg = jnp.float32(n) * jnp.float32(n) - num_pos
    const_sum = num_pos * k_m + num_neg * c_neg

    # ---- resident-X vs streaming kernel selection ---------------------------
    n_pad_res, tm_res = _resident_tiles(n)
    resident = n_pad_res * d_feat * itemsize <= resident_x_bytes
    if resident:
        n_pad, tm = n_pad_res, tm_res
    else:
        n_pad, tm, tn = _streaming_tiles(n, d_feat, itemsize)

    # pad with unit-norm rows (finite cosines); padded columns are masked in the
    # kernel, padded rows are sliced off the output below (keep both invariants).
    if n_pad != n:
        pad_rows = jnp.full((n_pad - n, d_feat), 1.0 / math.sqrt(d_feat), in_dtype)
        xn = jnp.concatenate([xn, pad_rows], axis=0)
        p_pad = jnp.concatenate(
            [p_flat, jnp.full((n_pad - n,), jnp.int32(-2147483647))], axis=0)
    else:
        p_pad = p_flat
    p_col = p_pad.reshape(n_pad, 1)
    p_row = p_pad.reshape(1, n_pad)
    scal = jnp.reshape(m_f, (1,))

    if resident:
        grid = (n_pad // tm,)
        kernel = _make_resident_kernel(tm, n_pad, n)
        x_bytes = n_pad * d_feat * itemsize
        vmem_need = 3 * x_bytes + 12 * tm * n_pad * 4 + 16 * n_pad + (2 << 20)
        cost = pl.CostEstimate(
            flops=2 * n_pad * n_pad * d_feat + 35 * n_pad * n_pad,
            transcendentals=n_pad * n_pad,
            bytes_accessed=x_bytes + 12 * n_pad + 4)
        row_sums = pl.pallas_call(
            kernel,
            out_shape=jax.ShapeDtypeStruct((n_pad, 1), jnp.float32),
            grid=grid,
            in_specs=[
                pl.BlockSpec(memory_space=pltpu.MemorySpace.SMEM),   # [m]
                pl.BlockSpec((n_pad, d_feat), lambda i: (0, 0)),     # resident xn
                pl.BlockSpec((n_pad, 1), lambda i: (0, 0)),          # labels (col)
                pl.BlockSpec((1, n_pad), lambda i: (0, 0)),          # labels (row)
            ],
            out_specs=pl.BlockSpec((tm, 1), lambda i: (i, 0)),
            compiler_params=pltpu.CompilerParams(
                dimension_semantics=("parallel",),
                vmem_limit_bytes=int(min(56 << 20, max(32 << 20, vmem_need)))),
            cost_estimate=cost,
        )(scal, xn, p_col, p_row)
    else:
        grid = (n_pad // tm, n_pad // tn)
        kernel = _make_streaming_kernel(tm, tn, n, n_pad)
        tile_x_bytes = (tm + tn) * d_feat * itemsize
        vmem_need = 2 * tile_x_bytes + 12 * tm * tn * 4 + (2 << 20)
        cost = pl.CostEstimate(
            flops=2 * n_pad * n_pad * d_feat + 35 * n_pad * n_pad,
            transcendentals=n_pad * n_pad,
            bytes_accessed=(n_pad // tm) * n_pad * d_feat * itemsize   # col re-reads
                           + n_pad * d_feat * itemsize                 # row reads
                           + 16 * n_pad)
        row_sums = pl.pallas_call(
            kernel,
            out_shape=jax.ShapeDtypeStruct((n_pad, 1), jnp.float32),
            grid=grid,
            in_specs=[
                pl.BlockSpec(memory_space=pltpu.MemorySpace.SMEM),   # [m]
                pl.BlockSpec((tm, d_feat), lambda i, j: (i, 0)),     # X row tile
                pl.BlockSpec((tn, d_feat), lambda i, j: (j, 0)),     # X col tile
                pl.BlockSpec((tm, 1), lambda i, j: (i, 0)),          # labels (col)
                pl.BlockSpec((1, tn), lambda i, j: (0, j)),          # labels (row)
            ],
            out_specs=pl.BlockSpec((tm, 1), lambda i, j: (i, 0)),
            scratch_shapes=[pltpu.VMEM((tm, 1), jnp.float32)],
            compiler_params=pltpu.CompilerParams(
                dimension_semantics=("parallel", "arbitrary"),
                vmem_limit_bytes=int(min(56 << 20, max(32 << 20, vmem_need)))),
            cost_estimate=cost,
        )(scal, xn, xn, p_col, p_row)

    total = jnp.sum(row_sums[:n, 0]) + const_sum
    return total / jnp.float32(n * n - n)


_domain_loss_jit = jax.jit(_domain_loss, static_argnames=("resident_x_bytes",))


def domain_loss_pallas(represent, p, m, resident_x_bytes=_RESIDENT_X_BYTES):
    """JAX/Pallas equivalent of domain_loss.forward(represent, p, m, d)."""
    return _domain_loss_jit(represent, p, m, resident_x_bytes=resident_x_bytes)


# ----------------------------------------------------------------------------
# Pure-JAX reference mirroring the PyTorch code, for validation
# ----------------------------------------------------------------------------
def _domain_loss_reference(represent, p, m):
    x = represent.astype(jnp.float32)
    n = x.shape[0]
    c3 = x @ x.T
    c1 = jnp.sqrt(jnp.sum(x * x, axis=-1, keepdims=True))
    c2 = c1.T
    pangle = c3 / (c1 @ c2)
    pv = p.reshape(n, 1).astype(jnp.float32)
    pos_mask = (pv == pv.T).astype(jnp.float32)
    neg_mask = 1.0 - pos_mask
    pos_pair = 1.0 - pos_mask * pangle
    neg_pair = jnp.maximum(0.0, neg_mask * pangle - m)
    pos_w = 0.5 * (1.0 + jax.scipy.special.erf((pos_pair - 0.2) / (0.5 * _SQRT2)))
    neg_w = 0.5 * (1.0 + jax.scipy.special.erf((neg_pair - 0.2) / (0.2 * _SQRT2)))
    loss_mat = pos_w * pos_pair + neg_w * neg_pair
    return jnp.sum(loss_mat) / (n * n - n)


if __name__ == "__main__":
    key = jax.random.PRNGKey(0)
    k1, k2, k3, k4 = jax.random.split(key, 4)

    # Small shapes consistent with the module: 8 sentence embeddings of dim 32.
    N, D = 8, 32
    represent = jax.random.normal(k1, (N, D), dtype=jnp.float32)
    p = jax.random.randint(k2, (N,), 0, 3)      # domain labels
    m = 0.1                                     # margin

    loss = jax.block_until_ready(domain_loss_pallas(represent, p, m))
    ref = jax.block_until_ready(_domain_loss_reference(represent, p, m))
    assert jnp.allclose(loss, ref, atol=2e-3, rtol=2e-3), (loss, ref)

    # Padded, multi-strip resident path (N=300 -> n_pad=384, 3 row strips of 128).
    N2, D2 = 300, 64
    rep2 = jax.random.normal(k3, (N2, D2), dtype=jnp.float32)
    p2 = jax.random.randint(k4, (N2,), 0, 4)
    loss2 = jax.block_until_ready(domain_loss_pallas(rep2, p2, m))
    ref2 = jax.block_until_ready(_domain_loss_reference(rep2, p2, m))
    assert jnp.allclose(loss2, ref2, atol=2e-3, rtol=2e-3), (loss2, ref2)

    # Streaming fallback (forced via a zero residency budget): 2-D grid, 512 tiles,
    # scratch row-sum accumulator, padded-column masking.
    loss3 = jax.block_until_ready(
        domain_loss_pallas(rep2, p2, m, resident_x_bytes=0))
    assert jnp.allclose(loss3, ref2, atol=2e-3, rtol=2e-3), (loss3, ref2)

    print("KERNEL_OK")
</pallas_src>

<mosaic_0001>
module attributes {stable_mosaic.version = 11 : i64} {
  func.func @kernel(%arg0: i32, %arg1: memref<1xf32, #tpu.memory_space<smem>>, %arg2: memref<8x32xf32, #tpu.memory_space<vmem>>, %arg3: memref<8x1xi32, #tpu.memory_space<vmem>>, %arg4: memref<1x8xi32, #tpu.memory_space<vmem>>, %arg5: memref<8x1xf32, #tpu.memory_space<vmem>>) attributes {dimension_semantics = [#tpu.dimension_semantics<parallel>], iteration_bounds = array<i64: 1>, scalar_prefetch = 0 : i64, scratch_operands = 0 : i64, tpu.core_type = #tpu.core_type<tc>, window_params = [{transform_indices = @transform_0, window_bounds = array<i64: 1>}, {pipeline_mode = #tpu.pipeline_mode<synchronous>, transform_indices = @transform_1, window_bounds = array<i64: 8, 32>}, {pipeline_mode = #tpu.pipeline_mode<synchronous>, transform_indices = @transform_2, window_bounds = array<i64: 8, 1>}, {pipeline_mode = #tpu.pipeline_mode<synchronous>, transform_indices = @transform_3, window_bounds = array<i64: 1, 8>}, {transform_indices = @transform_4, window_bounds = array<i64: 8, 1>}]} {
    %c0 = arith.constant 0 : index
    %0 = memref.load %arg1[%c0] : memref<1xf32, #tpu.memory_space<smem>>
    %c8_i32 = arith.constant 8 : i32
    %1 = arith.muli %arg0, %c8_i32 : i32
    %2 = tpu.assume_multiple %1, 8 : i32
    %3 = arith.index_cast %2 : i32 to index
    %c0_0 = arith.constant 0 : index
    %4 = vector.load %arg2[%3, %c0_0] : memref<8x32xf32, #tpu.memory_space<vmem>>, vector<8x32xf32>
    %c0_1 = arith.constant 0 : index
    %c0_2 = arith.constant 0 : index
    %5 = vector.load %arg2[%c0_1, %c0_2] : memref<8x32xf32, #tpu.memory_space<vmem>>, vector<8x32xf32>
    %cst = arith.constant dense<0.000000e+00> : vector<8x8xf32>
    %6 = tpu.matmul %4, %5, %cst {dimension_numbers = #tpu.dot_dimension_numbers<[1], [1], [0], [0], [0, 0, 1, 0], [], []>} : vector<8x32xf32>, vector<8x32xf32>, vector<8x8xf32> -> vector<8x8xf32>
    %7 = arith.index_cast %2 : i32 to index
    %c0_3 = arith.constant 0 : index
    %8 = vector.load %arg3[%7, %c0_3] : memref<8x1xi32, #tpu.memory_space<vmem>>, vector<8x1xi32>
    %c0_4 = arith.constant 0 : index
    %c0_5 = arith.constant 0 : index
    %9 = vector.load %arg4[%c0_4, %c0_5] : memref<1x8xi32, #tpu.memory_space<vmem>>, vector<1x8xi32>
    %10 = vector.broadcast %8 : vector<8x1xi32> to vector<8x8xi32>
    %11 = vector.broadcast %9 : vector<1x8xi32> to vector<8x8xi32>
    %12 = arith.cmpi eq, %10, %11 : vector<8x8xi32>
    %cst_6 = arith.constant 1.000000e+00 : f32
    %13 = vector.broadcast %cst_6 : f32 to vector<8x8xf32>
    %14 = arith.subf %13, %6 : vector<8x8xf32>
    %15 = vector.broadcast %0 : f32 to vector<8x8xf32>
    %16 = arith.subf %6, %15 : vector<8x8xf32>
    %cst_7 = arith.constant 0.000000e+00 : f32
    %17 = vector.broadcast %cst_7 : f32 to vector<8x8xf32>
    %18 = arith.maximumf %16, %17 : vector<8x8xf32>
    %19 = arith.select %12, %14, %18 : vector<8x8xi1>, vector<8x8xf32>
    %cst_8 = arith.constant 1.41421354 : f32
    %cst_9 = arith.constant 3.53553391 : f32
    %20 = vector.broadcast %cst_8 : f32 to vector<8x8xf32>
    %21 = vector.broadcast %cst_9 : f32 to vector<8x8xf32>
    %22 = arith.select %12, %20, %21 : vector<8x8xi1>, vector<8x8xf32>
    %cst_10 = arith.constant 2.000000e-01 : f32
    %23 = vector.broadcast %cst_10 : f32 to vector<8x8xf32>
    %24 = arith.subf %19, %23 : vector<8x8xf32>
    %25 = arith.mulf %24, %22 : vector<8x8xf32>
    %cst_11 = arith.constant 3.900000e+00 : f32
    %26 = vector.broadcast %cst_11 : f32 to vector<8x8xf32>
    %27 = arith.minimumf %25, %26 : vector<8x8xf32>
    %28 = arith.mulf %27, %27 : vector<8x8xf32>
    %cst_12 = arith.constant -2.72614237E-10 : f32
    %29 = vector.broadcast %cst_12 : f32 to vector<8x8xf32>
    %30 = arith.mulf %29, %28 : vector<8x8xf32>
    %cst_13 = arith.constant 2.77068146E-8 : f32
    %31 = vector.broadcast %cst_13 : f32 to vector<8x8xf32>
    %32 = arith.addf %30, %31 : vector<8x8xf32>
    %33 = arith.mulf %32, %28 : vector<8x8xf32>
    %cst_14 = arith.constant -2.10102394E-6 : f32
    %34 = vector.broadcast %cst_14 : f32 to vector<8x8xf32>
    %35 = arith.addf %33, %34 : vector<8x8xf32>
    %36 = arith.mulf %35, %28 : vector<8x8xf32>
    %cst_15 = arith.constant -5.69250624E-5 : f32
    %37 = vector.broadcast %cst_15 : f32 to vector<8x8xf32>
    %38 = arith.addf %36, %37 : vector<8x8xf32>
    %39 = arith.mulf %38, %28 : vector<8x8xf32>
    %cst_16 = arith.constant -7.34990637E-4 : f32
    %40 = vector.broadcast %cst_16 : f32 to vector<8x8xf32>
    %41 = arith.addf %39, %40 : vector<8x8xf32>
    %42 = arith.mulf %41, %28 : vector<8x8xf32>
    %cst_17 = arith.constant -2.954600e-03 : f32
    %43 = vector.broadcast %cst_17 : f32 to vector<8x8xf32>
    %44 = arith.addf %42, %43 : vector<8x8xf32>
    %45 = arith.mulf %44, %28 : vector<8x8xf32>
    %cst_18 = arith.constant -0.0160960332 : f32
    %46 = vector.broadcast %cst_18 : f32 to vector<8x8xf32>
    %47 = arith.addf %45, %46 : vector<8x8xf32>
    %cst_19 = arith.constant -1.45660715E-5 : f32
    %48 = vector.broadcast %cst_19 : f32 to vector<8x8xf32>
    %49 = arith.mulf %48, %28 : vector<8x8xf32>
    %cst_20 = arith.constant -2.13374049E-4 : f32
    %50 = vector.broadcast %cst_20 : f32 to vector<8x8xf32>
    %51 = arith.addf %49, %50 : vector<8x8xf32>
    %52 = arith.mulf %51, %28 : vector<8x8xf32>
    %cst_21 = arith.constant -0.00168282702 : f32
    %53 = vector.broadcast %cst_21 : f32 to vector<8x8xf32>
    %54 = arith.addf %52, %53 : vector<8x8xf32>
    %55 = arith.mulf %54, %28 : vector<8x8xf32>
    %cst_22 = arith.constant -0.00737332925 : f32
    %56 = vector.broadcast %cst_22 : f32 to vector<8x8xf32>
    %57 = arith.addf %55, %56 : vector<8x8xf32>
    %58 = arith.mulf %57, %28 : vector<8x8xf32>
    %cst_23 = arith.constant -0.0142647391 : f32
    %59 = vector.broadcast %cst_23 : f32 to vector<8x8xf32>
    %60 = arith.addf %58, %59 : vector<8x8xf32>
    %61 = arith.mulf %27, %47 : vector<8x8xf32>
    %62 = tpu.reciprocal %60 {approx = true} : vector<8x8xf32> -> vector<8x8xf32>
    %63 = arith.mulf %61, %62 : vector<8x8xf32>
    %cst_24 = arith.constant 1.000000e+00 : f32
    %64 = vector.broadcast %cst_24 : f32 to vector<8x8xf32>
    %65 = arith.addf %64, %63 : vector<8x8xf32>
    %cst_25 = arith.constant 5.000000e-01 : f32
    %66 = vector.broadcast %cst_25 : f32 to vector<8x8xf32>
    %67 = arith.mulf %66, %65 : vector<8x8xf32>
    %68 = arith.mulf %67, %19 : vector<8x8xf32>
    %cst_26 = arith.constant dense<0.000000e+00> : vector<8xf32>
    %69 = vector.multi_reduction <add>, %68, %cst_26 [1] : vector<8x8xf32> to vector<8xf32>
    %70 = vector.shape_cast %69 : vector<8xf32> to vector<8x1xf32>
    %c0_27 = arith.constant 0 : index
    %c0_28 = arith.constant 0 : index
    %71 = vector.load %arg5[%c0_27, %c0_28] : memref<8x1xf32, #tpu.memory_space<vmem>>, vector<8x1xf32>
    tpu.vector_store %arg5[%c0_27, %c0_28], %70 {strides = array<i32>} : memref<8x1xf32, #tpu.memory_space<vmem>>, vector<8x1xf32>,
    return
  }
  func.func @transform_0(%arg0: i32) -> i32 {
    %c0_i32 = arith.constant 0 : i32
    %c0_i32_0 = arith.constant 0 : i32
    return %c0_i32 : i32
  }
  func.func @transform_1(%arg0: i32) -> (i32, i32) {
    %c0_i32 = arith.constant 0 : i32
    %c0_i32_0 = arith.constant 0 : i32
    %c0_i32_1 = arith.constant 0 : i32
    return %c0_i32, %c0_i32_0 : i32, i32
  }
  func.func @transform_2(%arg0: i32) -> (i32, i32) {
    %c0_i32 = arith.constant 0 : i32
    %c0_i32_0 = arith.constant 0 : i32
    %c0_i32_1 = arith.constant 0 : i32
    return %c0_i32, %c0_i32_0 : i32, i32
  }
  func.func @transform_3(%arg0: i32) -> (i32, i32) {
    %c0_i32 = arith.constant 0 : i32
    %c0_i32_0 = arith.constant 0 : i32
    %c0_i32_1 = arith.constant 0 : i32
    return %c0_i32, %c0_i32_0 : i32, i32
  }
  func.func @transform_4(%arg0: i32) -> (i32, i32) {
    %c0_i32 = arith.constant 0 : i32
    %c0_i32_0 = arith.constant 0 : i32
    return %arg0, %c0_i32 : i32, i32
  }
}

</mosaic_0001>

<bundles_post_ra>
// kernel: _domain_loss.1
= control target key start
LH: loop header
LB: loop body
LE: loop exit
PB: predicated region body
PF: predicated region fallthrough
CT: control target
= control target key end

     0   :  { %vm23_vm0 = vcmask 261120   ;;  %v175_v0 = vmov 0.0   ;;  %vm176_vm1 = vmmov 0   ;;  %v177_v3 = vmov 0   ;;  %s219_s1 = inlined_call_operand.vmem [shape: f32[8,32], index: 1, kind: input, shape index: {}]   ;;  %s220_s2 = inlined_call_operand.vmem [shape: s32[8,1], index: 2, kind: input, shape index: {}]   ;;  %s221_s0 = inlined_call_operand.<no memory space> [shape: f32[1], index: 0, kind: input, shape index: {}]   ;;  %s222_s3 = inlined_call_operand.vmem [shape: s32[1,8], index: 3, kind: input, shape index: {}]   ;;  %s223_s4 = inlined_call_operand.vmem [shape: f32[8,1], index: 4, kind: output, shape index: {}]  }
   0x1   :  { %163 = vmatprep.subr.mxu0 %v175_v0  ;;  %v22_v1 = vld [vmem:[%s219_s1] sm:$0xff]  ;;  %165 = vmatprep.mubr.msk.f32.mxu0 %vm176_vm1, %v175_v0  ;;  %v112_v4 = vstv %s221_s0  ;;  %v178_v14 = vmov 3.535534   ;;  %vm147_vm3 = vcmask 64512   ;;  %vm151_vm4 = vcmask 7168  }
   0x2   :  { %v101_v2 = vld [vmem:[%s220_s2] sm:$0xff]  ;;  %164 = vmatpush3.xpose.msk.msra.mxu0 %vm23_vm0, %v22_v1  ;;  %172 = vset.pattern.permute.xlu0 %v177_v3 }
   0x3   :  { %104 = vperm.xlu0 %172, %v101_v2   ;;  %v159_v5 = vld [vmem:[%s222_s3] ss:$0 sm:$0xff] }
   0x5   :  { %166 = vmatmul.mubr.msk.f32.vlgmr.msra.gmra.mrb[0].mxu0 %vm23_vm0, %v22_v1 }
  0x82   :  { %v105_v6 = vpop.permute.xlu0 %104 }
  0x83   :  { %vm110_vm2 = vcmp.eq.s32.totalorder %v105_v6, %v159_v5 }
  0x84   :  { %v116_v15 = vsel %vm110_vm2, 1.4142135, %v178_v14 }
  0xd8   :  { %v96_v7 = vpop.f32.mrb[0].mxu0 }
  0xd9   :  { %v113_v8 = vsub.f32 %v96_v7, %v112_v4  ;;  %v167_v9 = vpop.f32.mrb[1].mxu0  ;;  %v111_v10 = vsub.f32 1.0, %v96_v7 }
  0xdb   :  { %v114_v11 = vmax.f32 %v113_v8, 0.0 }
  0xdd   :  { %v115_v12 = vsel %vm110_vm2, %v111_v10, %v114_v11 }
  0xde   :  { %v160_v13 = vadd.f32 -0.2, %v115_v12 }
  0xe0   :  { %v118_v16 = vmul.f32 %v160_v13, %v116_v15 }
  0xe2   :  { %v119_v17 = vmin.f32 %v118_v16, 3.9 }
  0xe4   :  { %v120_v18 = vmul.f32 %v119_v17, %v119_v17 }
  0xe6   :  { %v121_v19 = vmul.f32 -2.7261424e-10, %v120_v18  ;;  %v133_v20 = vmul.f32 -1.45660715e-05, %v120_v18 }
  0xe8   :  { %v122_v21 = vadd.f32 2.7706815e-08, %v121_v19  ;;  %v134_v22 = vadd.f32 -0.00021337405, %v133_v20 }
  0xea   :  { %v123_v23 = vmul.f32 %v122_v21, %v120_v18  ;;  %v135_v24 = vmul.f32 %v134_v22, %v120_v18 }
  0xec   :  { %v124_v25 = vadd.f32 -2.101024e-06, %v123_v23  ;;  %v136_v26 = vadd.f32 -0.001682827, %v135_v24 }
  0xee   :  { %v125_v27 = vmul.f32 %v124_v25, %v120_v18  ;;  %v137_v28 = vmul.f32 %v136_v26, %v120_v18 }
  0xf0   :  { %v126_v29 = vadd.f32 -5.6925062e-05, %v125_v27  ;;  %v138_v30 = vadd.f32 -0.0073733293, %v137_v28 }
  0xf2   :  { %v127_v31 = vmul.f32 %v126_v29, %v120_v18  ;;  %v139_v32 = vmul.f32 %v138_v30, %v120_v18 }
  0xf4   :  { %v128_v33 = vadd.f32 -0.00073499064, %v127_v31  ;;  %v140_v34 = vadd.f32 -0.014264739, %v139_v32 }
  0xf6   :  { %v129_v35 = vmul.f32 %v128_v33, %v120_v18  ;;  %173 = vrcp.f32 %v140_v34 }
  0xf8   :  { %v130_v36 = vadd.f32 -0.0029546, %v129_v35 }
  0xfa   :  { %v131_v37 = vmul.f32 %v130_v36, %v120_v18 }
  0xfc   :  { %v132_v38 = vadd.f32 -0.016096033, %v131_v37 }
  0xfe   :  { %v141_v39 = vmul.f32 %v132_v38, %v119_v17 }
 0x100   :  { %v174_v40 = vpop.eup %173 }
 0x101   :  { %v143_v41 = vmul.f32 %v174_v40, %v141_v39 }
 0x103   :  { %v144_v42 = vadd.f32 1.0, %v143_v41 }
 0x105   :  { %v145_v43 = vmul.f32 0.5, %v144_v42 }
 0x107   :  { %v146_v44 = vmul.f32 %v145_v43, %v115_v12 }
 0x109   :  { %v148_v45 = vsel %vm147_vm3, %v146_v44, 0.0 }
 0x10a   :  { %149 = vadd.xlane.f32.xlu0 %v148_v45 }
 0x197   :  { %v150_v46 = vpop.xlane.xlu0 %149 }
 0x198   :  { %152 = vst.msk [vmem:[%s223_s4] sm:$0xff] %vm151_vm4, %v150_v46 }

</bundles_post_ra>
